<compile_context>
chip_gen: v7x
topology: tpu7x:2x2x1
jax: 0.10.0
libtpu: 0.0.40
codegen_flags: <defaults>
</compile_context>

<pallas_src>
import jax
import jax.numpy as jnp
from jax.experimental import pallas as pl
from jax.experimental.pallas import tpu as pltpu


def _make_positional_table(num_hiddens: int, max_len: int) -> jnp.ndarray:
    """Same construction as the PyTorch __init__ (self.P), minus leading 1-dim."""
    pos = jnp.arange(max_len, dtype=jnp.float32).reshape(-1, 1)
    div = jnp.power(
        10000.0, jnp.arange(0, num_hiddens, 2, dtype=jnp.float32) / num_hiddens
    )
    x = pos / div  # (max_len, num_hiddens // 2)
    p = jnp.zeros((max_len, num_hiddens), dtype=jnp.float32)
    p = p.at[:, 0::2].set(jnp.sin(x))
    p = p.at[:, 1::2].set(jnp.cos(x))
    return p


# ----------------------------- kernels ------------------------------------ #

def _posenc_eval_kernel(x_ref, p_ref, o_ref):
    # x_ref: (tb, tl), p_ref: (1, tl) -> broadcast add over the batch rows.
    o_ref[...] = (x_ref[...] + p_ref[...]).astype(o_ref.dtype)


def _posenc_train_kernel(x_ref, p_ref, m_ref, o_ref):
    # m_ref already holds keep/(1-p) (inverted-dropout scaling), same dtype as x.
    o_ref[...] = ((x_ref[...] + p_ref[...]) * m_ref[...]).astype(o_ref.dtype)


# ----------------------------- tiling -------------------------------------- #

def _choose_tiles(b: int, flat_len: int, itemsize: int,
                  target_bytes: int = 2 * 1024 * 1024):
    """Pick (batch_tile, lane_tile) so each x block is ~target_bytes.

    lane_tile is a multiple of 128 (or the full row) -> lane-dense stores and
    legal (8, 128) tiling; batch_tile is a multiple of 8 or the full batch.
    Partial edge blocks are handled by Pallas' masked loads/stores.
    """
    min_rows = min(b, 8)
    lane_budget = max(128, (target_bytes // (itemsize * min_rows)) // 128 * 128)
    tl = flat_len if flat_len <= lane_budget else lane_budget
    rows = max(1, target_bytes // (tl * itemsize))
    if rows >= b:
        tb = b
    else:
        tb = min(b, max(8, (rows // 8) * 8))
    return tb, tl


# ----------------------------- wrapper ------------------------------------- #

def positional_encoding(x, p_table, *, dropout_p=0.0, training=False, rng_key=None):
    """Forward pass of PositionalEncoding.

    x: (batch, seq_len, num_hiddens); p_table: (max_len, num_hiddens).
    Returns dropout(x + P[:seq_len]) with inverted-dropout scaling when
    training=True, identity dropout when training=False (eval mode).
    """
    b, s, h = x.shape
    assert s <= p_table.shape[0] and h == p_table.shape[1]

    if training and dropout_p >= 1.0:
        # nn.Dropout(p=1.0) zeros everything in training mode (avoid 1/0).
        return jnp.zeros_like(x)

    flat_len = s * h
    x2 = x.reshape(b, flat_len)
    # Cast P to the activation dtype (halves P's DMA/VMEM for bf16 inputs).
    p2 = p_table[:s, :].astype(x.dtype).reshape(1, flat_len)

    itemsize = jnp.dtype(x.dtype).itemsize
    tb, tl = _choose_tiles(b, flat_len, itemsize)
    grid = (pl.cdiv(b, tb), pl.cdiv(flat_len, tl))

    x_spec = pl.BlockSpec((tb, tl), lambda i, j: (i, j))
    p_spec = pl.BlockSpec((1, tl), lambda i, j: (0, j))
    out_spec = pl.BlockSpec((tb, tl), lambda i, j: (i, j))

    apply_dropout = bool(training) and dropout_p > 0.0
    if apply_dropout:
        if rng_key is None:
            rng_key = jax.random.PRNGKey(0)
        keep = jax.random.bernoulli(rng_key, 1.0 - float(dropout_p), shape=(b, flat_len))
        scale = jnp.asarray(1.0 / (1.0 - float(dropout_p)), dtype=x.dtype)
        mask = keep.astype(x.dtype) * scale
        kernel = _posenc_train_kernel
        in_specs = [x_spec, p_spec, x_spec]
        args = (x2, p2, mask)
    else:
        kernel = _posenc_eval_kernel
        in_specs = [x_spec, p_spec]
        args = (x2, p2)

    out2 = pl.pallas_call(
        kernel,
        out_shape=jax.ShapeDtypeStruct((b, flat_len), x.dtype),
        grid_spec=pltpu.PrefetchScalarGridSpec(
            num_scalar_prefetch=0,
            grid=grid,
            in_specs=in_specs,
            out_specs=out_spec,
        ),
        compiler_params=pltpu.CompilerParams(
            dimension_semantics=("parallel", "parallel")),
    )(*args)
    return out2.reshape(b, s, h)


if __name__ == "__main__":
    # Small, module-consistent shapes: batch=2, seq=8, num_hiddens=32.
    num_hiddens = 32
    max_len = 64
    dropout_p = 0.1
    batch, seq = 2, 8

    key = jax.random.PRNGKey(0)
    x = jax.random.normal(key, (batch, seq, num_hiddens), dtype=jnp.float32)

    # Deterministic "parameter" construction (the PyTorch buffer self.P).
    p_table = _make_positional_table(num_hiddens, max_len)

    # Eval-mode forward (dropout = identity): check against plain-JAX reference.
    out_eval = positional_encoding(x, p_table, dropout_p=dropout_p, training=False)
    out_eval = jax.block_until_ready(out_eval)
    ref = x + p_table[None, :seq, :]
    assert jnp.allclose(out_eval, ref, atol=1e-6), "eval-mode mismatch"

    # Training-mode forward (deterministic mask via PRNGKey): each element must
    # be either dropped (0) or the kept value scaled by 1/(1-p).
    out_train = positional_encoding(
        x, p_table, dropout_p=dropout_p, training=True, rng_key=jax.random.PRNGKey(1)
    )
    out_train = jax.block_until_ready(out_train)
    assert out_train.shape == x.shape
    scaled = ref * (1.0 / (1.0 - dropout_p))
    ok = jnp.isclose(out_train, 0.0, atol=1e-6) | jnp.isclose(
        out_train, scaled, rtol=1e-5, atol=1e-5
    )
    assert bool(jnp.all(ok)), "training-mode dropout semantics mismatch"

    print("KERNEL_OK")
</pallas_src>

<mosaic_0001>
module attributes {stable_mosaic.version = 11 : i64} {
  func.func @_posenc_eval_kernel(%arg0: i32, %arg1: i32, %arg2: memref<2x256xf32, #tpu.memory_space<vmem>>, %arg3: memref<1x256xf32, #tpu.memory_space<vmem>>, %arg4: memref<2x256xf32, #tpu.memory_space<vmem>>) attributes {dimension_semantics = [#tpu.dimension_semantics<parallel>, #tpu.dimension_semantics<parallel>], iteration_bounds = array<i64: 1, 1>, scalar_prefetch = 0 : i64, scratch_operands = 0 : i64, tpu.core_type = #tpu.core_type<tc>, window_params = [{transform_indices = @transform_0, window_bounds = array<i64: 2, 256>}, {transform_indices = @transform_1, window_bounds = array<i64: 1, 256>}, {transform_indices = @transform_2, window_bounds = array<i64: 2, 256>}]} {
    %c0 = arith.constant 0 : index
    %c0_0 = arith.constant 0 : index
    %0 = vector.load %arg2[%c0, %c0_0] : memref<2x256xf32, #tpu.memory_space<vmem>>, vector<2x256xf32>
    %c0_1 = arith.constant 0 : index
    %c0_2 = arith.constant 0 : index
    %1 = vector.load %arg3[%c0_1, %c0_2] : memref<1x256xf32, #tpu.memory_space<vmem>>, vector<1x256xf32>
    %2 = vector.broadcast %1 : vector<1x256xf32> to vector<2x256xf32>
    %3 = arith.addf %0, %2 : vector<2x256xf32>
    %c0_3 = arith.constant 0 : index
    %c0_4 = arith.constant 0 : index
    %4 = vector.load %arg4[%c0_3, %c0_4] : memref<2x256xf32, #tpu.memory_space<vmem>>, vector<2x256xf32>
    tpu.vector_store %arg4[%c0_3, %c0_4], %3 {strides = array<i32>} : memref<2x256xf32, #tpu.memory_space<vmem>>, vector<2x256xf32>,
    return
  }
  func.func @transform_0(%arg0: i32, %arg1: i32) -> (i32, i32) {
    %c0_i32 = arith.constant 0 : i32
    return %arg0, %arg1 : i32, i32
  }
  func.func @transform_1(%arg0: i32, %arg1: i32) -> (i32, i32) {
    %c0_i32 = arith.constant 0 : i32
    %c0_i32_0 = arith.constant 0 : i32
    return %c0_i32, %arg1 : i32, i32
  }
  func.func @transform_2(%arg0: i32, %arg1: i32) -> (i32, i32) {
    %c0_i32 = arith.constant 0 : i32
    return %arg0, %arg1 : i32, i32
  }
}

</mosaic_0001>

<bundles_post_ra>
// kernel: tpu_custom_call.1
= control target key start
LH: loop header
LB: loop body
LE: loop exit
PB: predicated region body
PF: predicated region fallthrough
CT: control target
= control target key end

     0   :  { %7 = vsyncpa [#allocation3], 0  ;;  %s157_s0 = inlined_call_operand.hbm [shape: f32[2,256], index: 0, kind: input, shape index: {}]   ;;  %s158_s1 = inlined_call_operand.vmem [shape: f32[1,256], index: 1, kind: input, shape index: {}]   ;;  %s159_s2 = inlined_call_operand.hbm [shape: f32[2,256], index: 2, kind: output, shape index: {}]  }
   0x1   :  { %8 = vsyncpa [#allocation4], 0  ;;  %s112_s9 = smov [#allocation2]   ;;  %s64_s13 = scalar_lea.hbm %s157_s0, 64 }
   0x2   :  { %s15_s10 = sshll.u32 %s112_s9, 4  ;;  %p65_p0 = scmp.ne.s32.totalorder %s157_s0, %s64_s13  ;;  %s16_s10 = int_to_ptr.vmem [resolvable:$true] %s15_s10 }
   0x3   :  { %p68_p1 = scmp.lt.u32.totalorder %s64_s13, %s157_s0 }
   0x5   :  { %p70_p2 = pnand %p68_p1, %p65_p0 }
   0x7   :  { %73 = shalt.err (!%p70_p2)
}
   0x8   :  { %s74_s18 = scalar_lea.vmem %s16_s10, 64  ;;  %p79_p4 = scmp.lt.s32.totalorder %s16_s10, %s16_s10 }
   0x9   :  { %p75_p3 = scmp.ne.s32.totalorder %s16_s10, %s74_s18  ;;  %p80_p5 = scmp.lt.s32.totalorder %s74_s18, %s74_s18 }
   0xb   :  { %p81_p6 = por %p80_p5, %p79_p4 }
   0xd   :  { %p82_p7 = pnand %p81_p6, %p75_p3 }
   0xf   :  { %85 = shalt.err (!%p82_p7)
}
  0x10   :  { %18 = dma.hbm_to_vmem [thread:$0]  %s157_s0, 64, %s16_s10, [#allocation3]  }
  0x11   :  { %108 = dma.done.wait [#allocation3], 64  }
  0x12   :  { %109 = vsyncadd [#allocation3], 4294967232  ;;  %v27_v0 = vlaneseq  ;;  %v113_v1 = vmov 1983009808   ;;  %v25_v7 = vld [vmem:[%s158_s1] sm:$0x3] }
  0x13   :  { %v37_v2 = vunpack.c.l.s4 %v113_v1  ;;  %v24_v12 = vld [vmem:[#allocation2] sm:$0xf]  ;;  %s114_s23 = smov [#allocation5]  }
  0x14   :  { %v28_v3 = vshrl.u32 %v27_v0, 7  ;;  %s52_s0 = sshll.u32 %s114_s23, 4  ;;  %s53_s0 = int_to_ptr.vmem [resolvable:$true] %s52_s0 }
  0x15   :  { %v38_v6 = vunpack.c.0.s8 %v37_v2  ;;  %s86_s24 = scalar_lea.vmem %s53_s0, 64  ;;  %p91_p9 = scmp.lt.s32.totalorder %s53_s0, %s53_s0 }
  0x16   :  { %v29_v4 = vsub.s32 0, %v28_v3  ;;  %v33_v5 = vsub.s32 1, %v28_v3  ;;  %p87_p8 = scmp.ne.s32.totalorder %s53_s0, %s86_s24  ;;  %p92_p10 = scmp.lt.s32.totalorder %s86_s24, %s86_s24 }
  0x17   :  { %v41_v10 = vsub.s32 %v38_v6, %v28_v3 }
  0x18   :  { %v30_v8 = vrot.slane %v25_v7, %v29_v4  ;;  %v34_v9 = vrot.slane %v25_v7, %v33_v5  ;;  %p93_p11 = por %p92_p10, %p91_p9 }
  0x1a   :  { %v35_v11 = vcombine.low %v30_v8, %v34_v9  ;;  %p94_p12 = pnand %p93_p11, %p87_p8 }
  0x1c   :  { %v42_v13 = vrot.slane %v35_v11, %v41_v10 }
  0x1e   :  { %v44_v14 = vadd.f32 %v42_v13, %v24_v12 }
  0x20   :  { %45 = vst [vmem:[#allocation5] sm:$0xf] %v44_v14 }
  0x21   :  { %97 = shalt.err (!%p94_p12)
}
  0x22   :  { %s98_s26 = scalar_lea.hbm %s159_s2, 64 }
  0x23   :  { %p99_p13 = scmp.ne.s32.totalorder %s159_s2, %s98_s26  ;;  %p102_p0 = scmp.lt.u32.totalorder %s98_s26, %s159_s2 }
  0x25   :  { %p104_p1 = pnand %p102_p0, %p99_p13 }
  0x27   :  { %107 = shalt.err (!%p104_p1)
}
  0x28   :  { %55 = dma.vmem_to_hbm [thread:$0]  %s53_s0, 64, %s159_s2, [#allocation4]  }
  0x29   :  { %110 = dma.done.wait [#allocation4], 64  }
  0x2a   :  { %111 = vsyncadd [#allocation4], 4294967232 }
  0x2b   :  { %59 = vsyncpa [#allocation3], 1 }
  0x2c   :  { %60 = vsyncpa [#allocation4], 1 }

</bundles_post_ra>
